<compile_context>
chip_gen: v7x
topology: tpu7x:2x2x1
jax: 0.10.0
libtpu: 0.0.40
codegen_flags: <defaults>
</compile_context>

<pallas_src>
import functools

import jax
import jax.numpy as jnp
from jax.experimental import pallas as pl
from jax.experimental.pallas import tpu as pltpu

_LANE = 128      # vreg lane width  -> feature padding
_SUBLANE = 16    # bf16 sublane packing -> batch padding
_MAX_TB = 512    # largest batch tile (amortizes per-grid-step overhead)


def _csac_kernel(Hp, Ap,
                 x_ref, h_ref,
                 w1_ref, wg_ref, w2_ref, wa_ref, b_ref,
                 out_ref, hout_ref):
    """One batch tile of the CSACAgent forward pass (use_rnn=True / GRUCell)."""
    x = x_ref[...]                     # (TB, Ip)  bf16
    h_f32 = h_ref[...]                 # (TB, Hp)  f32 (aliased to h output)
    h_bf = h_f32.astype(jnp.bfloat16)

    # Packed biases (f32): [b1 | bi_r+bh_r | bi_z+bh_z | bi_n | bh_n | b2 | b_act]
    b1 = b_ref[:, 0:Hp]
    b_r = b_ref[:, Hp:2 * Hp]
    b_z = b_ref[:, 2 * Hp:3 * Hp]
    bi_n = b_ref[:, 3 * Hp:4 * Hp]
    bh_n = b_ref[:, 4 * Hp:5 * Hp]
    b2 = b_ref[:, 5 * Hp:6 * Hp]
    ba = b_ref[:, 6 * Hp:6 * Hp + Ap]

    # x1 = relu(fc1(inputs))   (bf16 MXU operands, f32 accumulation)
    x1 = jnp.dot(x, w1_ref[...], preferred_element_type=jnp.float32) + b1
    x1 = jnp.maximum(x1, 0.0)

    # Fused GRU matmul: one K=2*Hp, N=4*Hp MXU pass producing
    #   [r_pre (x+h summed) | z_pre (x+h summed) | gi_n | gh_n]
    xh = jnp.concatenate([x1.astype(jnp.bfloat16), h_bf], axis=1)
    g = jnp.dot(xh, wg_ref[...], preferred_element_type=jnp.float32)

    r = jax.nn.sigmoid(g[:, 0:Hp] + b_r)
    z = jax.nn.sigmoid(g[:, Hp:2 * Hp] + b_z)
    n = jnp.tanh(g[:, 2 * Hp:3 * Hp] + bi_n + r * (g[:, 3 * Hp:4 * Hp] + bh_n))
    # h' = (1 - z) * n + z * h  ==  n + z * (h - n)
    h_new = n + z * (h_f32 - n)

    # x2 = relu(fc2(h'))
    x2 = jnp.dot(h_new.astype(jnp.bfloat16), w2_ref[...],
                 preferred_element_type=jnp.float32) + b2
    x2 = jnp.maximum(x2, 0.0)

    # outputs = action_head(x2)
    out = jnp.dot(x2.astype(jnp.bfloat16), wa_ref[...],
                  preferred_element_type=jnp.float32) + ba

    out_ref[...] = out
    hout_ref[...] = h_new


def _round_up(x, m):
    return (x + m - 1) // m * m


def _pad2(a, rows, cols):
    return jnp.pad(a, ((0, rows - a.shape[0]), (0, cols - a.shape[1])))


def _batch_tile(B):
    """Large tiles amortize the per-grid-step overhead, but cap at ceil(B/2) so the
    batch grid has >= 2 steps whenever the batch is big enough to split (v7x)."""
    half = _round_up(pl.cdiv(B, 2), _SUBLANE)
    return max(_SUBLANE, min(_MAX_TB, half))


@jax.jit
def csac_agent_forward(inputs, hidden_state, params):
    """CSACAgent.forward (use_rnn=True). Returns (outputs, h).

    inputs:       (B, input_shape) float32
    hidden_state: (B, hidden_dim)  float32 (already reshaped to (-1, hidden_dim))
    params:       dict of pre-transposed (in, out) weights and (1, out) biases,
                  GRU weights/biases concatenated in PyTorch gate order (r, z, n).
    """
    B, I = inputs.shape
    H = hidden_state.shape[1]
    A = params["ba"].shape[1]

    Ip = _round_up(I, _LANE)
    Hp = _round_up(H, _LANE)
    Ap = _round_up(A, _LANE)
    TB = _batch_tile(B)
    Bp = _round_up(B, TB)
    n_tiles = Bp // TB

    # ---- activations: zero-pad; x streamed as bf16, h kept f32 (aliased to h-out).
    x = _pad2(inputs, Bp, Ip).astype(jnp.bfloat16)
    h = _pad2(hidden_state, Bp, Hp)

    # ---- parameters: lane-pad, bf16 matmul operands, fused GRU weight, folded biases.
    def gate(w, g):
        return w[:, g * H:(g + 1) * H]

    blk = lambda w: _pad2(w, Hp, Hp)
    zero_hh = jnp.zeros((Hp, Hp), jnp.float32)

    w1 = _pad2(params["w1"], Ip, Hp).astype(jnp.bfloat16)
    wg = jnp.concatenate([
        jnp.concatenate([blk(gate(params["wi"], 0)), blk(gate(params["wi"], 1)),
                         blk(gate(params["wi"], 2)), zero_hh], axis=1),
        jnp.concatenate([blk(gate(params["wh"], 0)), blk(gate(params["wh"], 1)),
                         zero_hh, blk(gate(params["wh"], 2))], axis=1),
    ], axis=0).astype(jnp.bfloat16)                       # (2*Hp, 4*Hp)
    w2 = _pad2(params["w2"], Hp, Hp).astype(jnp.bfloat16)
    wa = _pad2(params["wa"], Hp, Ap).astype(jnp.bfloat16)

    b_all = jnp.concatenate([
        _pad2(params["b1"], 1, Hp),
        _pad2(gate(params["bi"], 0) + gate(params["bh"], 0), 1, Hp),  # r (pre-folded)
        _pad2(gate(params["bi"], 1) + gate(params["bh"], 1), 1, Hp),  # z (pre-folded)
        _pad2(gate(params["bi"], 2), 1, Hp),                          # n, input side
        _pad2(gate(params["bh"], 2), 1, Hp),                          # n, hidden side
        _pad2(params["b2"], 1, Hp),
        _pad2(params["ba"], 1, Ap),
    ], axis=1)                                            # (1, 6*Hp + Ap) f32

    # ---- VMEM budget: single-buffered weights + double-buffered activation tiles.
    weight_bytes = 2 * (Ip * Hp + 2 * Hp * 4 * Hp + Hp * Hp + Hp * Ap) + 4 * (6 * Hp + Ap)
    act_bytes = 2 * TB * (2 * Ip + 4 * Hp + 4 * Ap + 4 * Hp)   # double-buffered streams
    vmem_limit = int(min(64 << 20, max(32 << 20, 2 * (weight_bytes + act_bytes) + (8 << 20))))

    flops = 2 * Bp * (Ip * Hp + 8 * Hp * Hp + Hp * Hp + Hp * Ap)
    bytes_accessed = Bp * Ip * 2 + 2 * Bp * Hp * 4 + Bp * Ap * 4 + weight_bytes

    batch_spec = lambda shape: pl.BlockSpec(shape, lambda i: (i, 0))
    resident = lambda shape: pl.BlockSpec(shape, lambda i: (0, 0),
                                          pipeline_mode=pl.Buffered(1))

    out_p, h_p = pl.pallas_call(
        functools.partial(_csac_kernel, Hp, Ap),
        out_shape=(
            jax.ShapeDtypeStruct((Bp, Ap), jnp.float32),
            jax.ShapeDtypeStruct((Bp, Hp), jnp.float32),
        ),
        grid=(n_tiles,),
        in_specs=[
            batch_spec((TB, Ip)),          # inputs tile (bf16)
            batch_spec((TB, Hp)),          # hidden-state tile (f32, aliased to h-out)
            resident((Ip, Hp)),            # fc1 weight
            resident((2 * Hp, 4 * Hp)),    # fused GRU weight [r|z|n_i|n_h]
            resident((Hp, Hp)),            # fc2 weight
            resident((Hp, Ap)),            # action head weight
            resident((1, 6 * Hp + Ap)),    # packed biases
        ],
        out_specs=(
            batch_spec((TB, Ap)),
            batch_spec((TB, Hp)),
        ),
        input_output_aliases={1: 1},       # reuse the padded h buffer for h-out
        compiler_params=pltpu.CompilerParams(
            dimension_semantics=("parallel",),
            vmem_limit_bytes=vmem_limit,
        ),
        cost_estimate=pl.CostEstimate(
            flops=flops,
            transcendentals=3 * Bp * Hp,
            bytes_accessed=bytes_accessed,
        ),
    )(x, h, w1, wg, w2, wa, b_all)

    return out_p[:B, :A], h_p[:B, :H]


def _linear_params(key, in_dim, out_dim):
    """Deterministic init; weight stored pre-transposed as (in, out), bias as (1, out)."""
    kw, kb = jax.random.split(key)
    bound = 1.0 / (in_dim ** 0.5)
    w = jax.random.uniform(kw, (in_dim, out_dim), jnp.float32, -bound, bound)
    b = jax.random.uniform(kb, (1, out_dim), jnp.float32, -bound, bound)
    return w, b


def make_params(key, input_shape, hidden_dim, n_actions, n_agents):
    out_dim = n_actions ** n_agents  # action_head: n_actions ** n_agents
    keys = jax.random.split(key, 4)
    p = {}
    p["w1"], p["b1"] = _linear_params(keys[0], input_shape, hidden_dim)
    # GRUCell: weight_ih / weight_hh are (3H, H) in PyTorch (gate order r, z, n),
    # stored here pre-transposed and concatenated as (H, 3H).
    k_ih, k_hh = jax.random.split(keys[1])
    p["wi"], p["bi"] = _linear_params(k_ih, hidden_dim, 3 * hidden_dim)
    p["wh"], p["bh"] = _linear_params(k_hh, hidden_dim, 3 * hidden_dim)
    p["w2"], p["b2"] = _linear_params(keys[2], hidden_dim, hidden_dim)
    p["wa"], p["ba"] = _linear_params(keys[3], hidden_dim, out_dim)
    return p


def _reference_forward(inputs, hidden_state, p, matmul_dtype=jnp.float32):
    """Plain-JAX reference of the PyTorch CSACAgent (use_rnn=True path).

    matmul_dtype=jnp.bfloat16 mirrors the kernel's MXU operand precision
    (f32 accumulation, f32 gate math) for a tight-tolerance structural check.
    """
    H = hidden_state.shape[1]

    def mm(a, w):
        return jnp.dot(a.astype(matmul_dtype), w.astype(matmul_dtype),
                       preferred_element_type=jnp.float32)

    x1 = jax.nn.relu(mm(inputs, p["w1"]) + p["b1"])
    gi = mm(x1, p["wi"]) + p["bi"]
    gh = mm(hidden_state, p["wh"]) + p["bh"]
    r = jax.nn.sigmoid(gi[:, 0:H] + gh[:, 0:H])
    z = jax.nn.sigmoid(gi[:, H:2 * H] + gh[:, H:2 * H])
    n = jnp.tanh(gi[:, 2 * H:3 * H] + r * gh[:, 2 * H:3 * H])
    h = (1.0 - z) * n + z * hidden_state
    x2 = jax.nn.relu(mm(h, p["w2"]) + p["b2"])
    out = mm(x2, p["wa"]) + p["ba"]
    return out, h


if __name__ == "__main__":
    # Small shapes consistent with the module.
    batch = 2
    input_shape = 16
    hidden_dim = 32
    n_actions = 4
    n_agents = 2

    key = jax.random.PRNGKey(0)
    k_in, k_h, k_p = jax.random.split(key, 3)
    inputs = jax.random.normal(k_in, (batch, input_shape), jnp.float32)
    # hidden_state.reshape(-1, hidden_dim) — already provided flat.
    hidden_state = jax.random.normal(k_h, (batch, hidden_dim), jnp.float32)
    params = make_params(k_p, input_shape, hidden_dim, n_actions, n_agents)

    outputs, h = csac_agent_forward(inputs, hidden_state, params)
    jax.block_until_ready((outputs, h))

    assert outputs.shape == (batch, n_actions ** n_agents)
    assert h.shape == (batch, hidden_dim)

    # Tight check vs. a reference matching the kernel's bf16-operand / f32-accum matmuls.
    out_m, h_m = _reference_forward(inputs, hidden_state, params,
                                    matmul_dtype=jnp.bfloat16)
    assert jnp.allclose(outputs, out_m, atol=1e-3, rtol=1e-3)
    assert jnp.allclose(h, h_m, atol=1e-3, rtol=1e-3)

    # Loose check vs. the full-f32 PyTorch-equivalent reference.
    out_f, h_f = _reference_forward(inputs, hidden_state, params)
    assert jnp.allclose(outputs, out_f, atol=5e-2, rtol=5e-2)
    assert jnp.allclose(h, h_f, atol=5e-2, rtol=5e-2)

    print("KERNEL_OK")
</pallas_src>

<mosaic_0001>
module attributes {stable_mosaic.version = 11 : i64} {
  func.func @_csac_kernel(%arg0: i32, %arg1: memref<16x128xbf16, #tpu.memory_space<vmem>>, %arg2: memref<16x128xf32, #tpu.memory_space<vmem>>, %arg3: memref<128x128xbf16, #tpu.memory_space<vmem>>, %arg4: memref<256x512xbf16, #tpu.memory_space<vmem>>, %arg5: memref<128x128xbf16, #tpu.memory_space<vmem>>, %arg6: memref<128x128xbf16, #tpu.memory_space<vmem>>, %arg7: memref<1x896xf32, #tpu.memory_space<vmem>>, %arg8: memref<16x128xf32, #tpu.memory_space<vmem>>, %arg9: memref<16x128xf32, #tpu.memory_space<vmem>>) attributes {dimension_semantics = [#tpu.dimension_semantics<parallel>], iteration_bounds = array<i64: 1>, scalar_prefetch = 0 : i64, scratch_operands = 0 : i64, tpu.core_type = #tpu.core_type<tc>, window_params = [{transform_indices = @transform_0, window_bounds = array<i64: 16, 128>}, {transform_indices = @transform_1, window_bounds = array<i64: 16, 128>}, {pipeline_mode = #tpu.pipeline_mode<synchronous>, transform_indices = @transform_2, window_bounds = array<i64: 128, 128>}, {pipeline_mode = #tpu.pipeline_mode<synchronous>, transform_indices = @transform_3, window_bounds = array<i64: 256, 512>}, {pipeline_mode = #tpu.pipeline_mode<synchronous>, transform_indices = @transform_4, window_bounds = array<i64: 128, 128>}, {pipeline_mode = #tpu.pipeline_mode<synchronous>, transform_indices = @transform_5, window_bounds = array<i64: 128, 128>}, {pipeline_mode = #tpu.pipeline_mode<synchronous>, transform_indices = @transform_6, window_bounds = array<i64: 1, 896>}, {transform_indices = @transform_7, window_bounds = array<i64: 16, 128>}, {transform_indices = @transform_8, window_bounds = array<i64: 16, 128>}]} {
    %c0 = arith.constant 0 : index
    %c0_0 = arith.constant 0 : index
    %0 = vector.load %arg1[%c0, %c0_0] : memref<16x128xbf16, #tpu.memory_space<vmem>>, vector<16x128xbf16>
    %c0_1 = arith.constant 0 : index
    %c0_2 = arith.constant 0 : index
    %1 = vector.load %arg2[%c0_1, %c0_2] : memref<16x128xf32, #tpu.memory_space<vmem>>, vector<16x128xf32>
    %2 = arith.truncf %1 : vector<16x128xf32> to vector<16x128xbf16>
    %c0_3 = arith.constant 0 : index
    %c0_4 = arith.constant 0 : index
    %3 = vector.load %arg7[%c0_3, %c0_4] : memref<1x896xf32, #tpu.memory_space<vmem>>, vector<1x128xf32>
    %c0_5 = arith.constant 0 : index
    %c128 = arith.constant 128 : index
    %4 = vector.load %arg7[%c0_5, %c128] : memref<1x896xf32, #tpu.memory_space<vmem>>, vector<1x128xf32>
    %c0_6 = arith.constant 0 : index
    %c256 = arith.constant 256 : index
    %5 = vector.load %arg7[%c0_6, %c256] : memref<1x896xf32, #tpu.memory_space<vmem>>, vector<1x128xf32>
    %c0_7 = arith.constant 0 : index
    %c384 = arith.constant 384 : index
    %6 = vector.load %arg7[%c0_7, %c384] : memref<1x896xf32, #tpu.memory_space<vmem>>, vector<1x128xf32>
    %c0_8 = arith.constant 0 : index
    %c512 = arith.constant 512 : index
    %7 = vector.load %arg7[%c0_8, %c512] : memref<1x896xf32, #tpu.memory_space<vmem>>, vector<1x128xf32>
    %c0_9 = arith.constant 0 : index
    %c640 = arith.constant 640 : index
    %8 = vector.load %arg7[%c0_9, %c640] : memref<1x896xf32, #tpu.memory_space<vmem>>, vector<1x128xf32>
    %c0_10 = arith.constant 0 : index
    %c768 = arith.constant 768 : index
    %9 = vector.load %arg7[%c0_10, %c768] : memref<1x896xf32, #tpu.memory_space<vmem>>, vector<1x128xf32>
    %c0_11 = arith.constant 0 : index
    %c0_12 = arith.constant 0 : index
    %10 = vector.load %arg3[%c0_11, %c0_12] : memref<128x128xbf16, #tpu.memory_space<vmem>>, vector<128x128xbf16>
    %cst = arith.constant dense<0.000000e+00> : vector<16x128xf32>
    %11 = tpu.matmul %0, %10, %cst {dimension_numbers = #tpu.dot_dimension_numbers<[1], [0], [0], [1], [0, 0, 1, 1], [], []>} : vector<16x128xbf16>, vector<128x128xbf16>, vector<16x128xf32> -> vector<16x128xf32>
    %12 = vector.broadcast %3 : vector<1x128xf32> to vector<16x128xf32>
    %13 = arith.addf %11, %12 : vector<16x128xf32>
    %cst_13 = arith.constant 0.000000e+00 : f32
    %14 = vector.broadcast %cst_13 : f32 to vector<16x128xf32>
    %15 = arith.maximumf %13, %14 : vector<16x128xf32>
    %16 = arith.truncf %15 : vector<16x128xf32> to vector<16x128xbf16>
    %17 = tpu.concatenate %16, %2 in 1 : vector<16x128xbf16>, vector<16x128xbf16> -> vector<16x256xbf16>
    %c0_14 = arith.constant 0 : index
    %c0_15 = arith.constant 0 : index
    %18 = vector.load %arg4[%c0_14, %c0_15] : memref<256x512xbf16, #tpu.memory_space<vmem>>, vector<256x512xbf16>
    %cst_16 = arith.constant dense<0.000000e+00> : vector<16x512xf32>
    %19 = tpu.matmul %17, %18, %cst_16 {dimension_numbers = #tpu.dot_dimension_numbers<[1], [0], [0], [1], [0, 0, 1, 1], [], []>} : vector<16x256xbf16>, vector<256x512xbf16>, vector<16x512xf32> -> vector<16x512xf32>
    %20 = vector.extract_strided_slice %19 {offsets = [0, 0], sizes = [16, 128], strides = [1, 1]} : vector<16x512xf32> to vector<16x128xf32>
    %21 = vector.broadcast %4 : vector<1x128xf32> to vector<16x128xf32>
    %22 = arith.addf %20, %21 : vector<16x128xf32>
    %23 = arith.negf %22 : vector<16x128xf32>
    %24 = math.exp %23 : vector<16x128xf32>
    %cst_17 = arith.constant 1.000000e+00 : f32
    %25 = vector.broadcast %cst_17 : f32 to vector<16x128xf32>
    %26 = arith.addf %25, %24 : vector<16x128xf32>
    %27 = arith.divf %25, %26 : vector<16x128xf32>
    %28 = vector.extract_strided_slice %19 {offsets = [0, 128], sizes = [16, 128], strides = [1, 1]} : vector<16x512xf32> to vector<16x128xf32>
    %29 = vector.broadcast %5 : vector<1x128xf32> to vector<16x128xf32>
    %30 = arith.addf %28, %29 : vector<16x128xf32>
    %31 = arith.negf %30 : vector<16x128xf32>
    %32 = math.exp %31 : vector<16x128xf32>
    %cst_18 = arith.constant 1.000000e+00 : f32
    %33 = vector.broadcast %cst_18 : f32 to vector<16x128xf32>
    %34 = arith.addf %33, %32 : vector<16x128xf32>
    %35 = arith.divf %33, %34 : vector<16x128xf32>
    %36 = vector.extract_strided_slice %19 {offsets = [0, 256], sizes = [16, 128], strides = [1, 1]} : vector<16x512xf32> to vector<16x128xf32>
    %37 = vector.broadcast %6 : vector<1x128xf32> to vector<16x128xf32>
    %38 = arith.addf %36, %37 : vector<16x128xf32>
    %39 = vector.extract_strided_slice %19 {offsets = [0, 384], sizes = [16, 128], strides = [1, 1]} : vector<16x512xf32> to vector<16x128xf32>
    %40 = vector.broadcast %7 : vector<1x128xf32> to vector<16x128xf32>
    %41 = arith.addf %39, %40 : vector<16x128xf32>
    %42 = arith.mulf %27, %41 : vector<16x128xf32>
    %43 = arith.addf %38, %42 : vector<16x128xf32>
    %44 = math.tanh %43 : vector<16x128xf32>
    %45 = arith.subf %1, %44 : vector<16x128xf32>
    %46 = arith.mulf %35, %45 : vector<16x128xf32>
    %47 = arith.addf %44, %46 : vector<16x128xf32>
    %48 = arith.truncf %47 : vector<16x128xf32> to vector<16x128xbf16>
    %c0_19 = arith.constant 0 : index
    %c0_20 = arith.constant 0 : index
    %49 = vector.load %arg5[%c0_19, %c0_20] : memref<128x128xbf16, #tpu.memory_space<vmem>>, vector<128x128xbf16>
    %cst_21 = arith.constant dense<0.000000e+00> : vector<16x128xf32>
    %50 = tpu.matmul %48, %49, %cst_21 {dimension_numbers = #tpu.dot_dimension_numbers<[1], [0], [0], [1], [0, 0, 1, 1], [], []>} : vector<16x128xbf16>, vector<128x128xbf16>, vector<16x128xf32> -> vector<16x128xf32>
    %51 = vector.broadcast %8 : vector<1x128xf32> to vector<16x128xf32>
    %52 = arith.addf %50, %51 : vector<16x128xf32>
    %cst_22 = arith.constant 0.000000e+00 : f32
    %53 = vector.broadcast %cst_22 : f32 to vector<16x128xf32>
    %54 = arith.maximumf %52, %53 : vector<16x128xf32>
    %55 = arith.truncf %54 : vector<16x128xf32> to vector<16x128xbf16>
    %c0_23 = arith.constant 0 : index
    %c0_24 = arith.constant 0 : index
    %56 = vector.load %arg6[%c0_23, %c0_24] : memref<128x128xbf16, #tpu.memory_space<vmem>>, vector<128x128xbf16>
    %cst_25 = arith.constant dense<0.000000e+00> : vector<16x128xf32>
    %57 = tpu.matmul %55, %56, %cst_25 {dimension_numbers = #tpu.dot_dimension_numbers<[1], [0], [0], [1], [0, 0, 1, 1], [], []>} : vector<16x128xbf16>, vector<128x128xbf16>, vector<16x128xf32> -> vector<16x128xf32>
    %58 = vector.broadcast %9 : vector<1x128xf32> to vector<16x128xf32>
    %59 = arith.addf %57, %58 : vector<16x128xf32>
    %c0_26 = arith.constant 0 : index
    %c0_27 = arith.constant 0 : index
    %60 = vector.load %arg8[%c0_26, %c0_27] : memref<16x128xf32, #tpu.memory_space<vmem>>, vector<16x128xf32>
    tpu.vector_store %arg8[%c0_26, %c0_27], %59 {strides = array<i32>} : memref<16x128xf32, #tpu.memory_space<vmem>>, vector<16x128xf32>,
    %c0_28 = arith.constant 0 : index
    %c0_29 = arith.constant 0 : index
    %61 = vector.load %arg9[%c0_28, %c0_29] : memref<16x128xf32, #tpu.memory_space<vmem>>, vector<16x128xf32>
    tpu.vector_store %arg9[%c0_28, %c0_29], %47 {strides = array<i32>} : memref<16x128xf32, #tpu.memory_space<vmem>>, vector<16x128xf32>,
    return
  }
  func.func @transform_0(%arg0: i32) -> (i32, i32) {
    %c0_i32 = arith.constant 0 : i32
    %c0_i32_0 = arith.constant 0 : i32
    return %arg0, %c0_i32 : i32, i32
  }
  func.func @transform_1(%arg0: i32) -> (i32, i32) {
    %c0_i32 = arith.constant 0 : i32
    %c0_i32_0 = arith.constant 0 : i32
    return %arg0, %c0_i32 : i32, i32
  }
  func.func @transform_2(%arg0: i32) -> (i32, i32) {
    %c0_i32 = arith.constant 0 : i32
    %c0_i32_0 = arith.constant 0 : i32
    %c0_i32_1 = arith.constant 0 : i32
    return %c0_i32, %c0_i32_0 : i32, i32
  }
  func.func @transform_3(%arg0: i32) -> (i32, i32) {
    %c0_i32 = arith.constant 0 : i32
    %c0_i32_0 = arith.constant 0 : i32
    %c0_i32_1 = arith.constant 0 : i32
    return %c0_i32, %c0_i32_0 : i32, i32
  }
  func.func @transform_4(%arg0: i32) -> (i32, i32) {
    %c0_i32 = arith.constant 0 : i32
    %c0_i32_0 = arith.constant 0 : i32
    %c0_i32_1 = arith.constant 0 : i32
    return %c0_i32, %c0_i32_0 : i32, i32
  }
  func.func @transform_5(%arg0: i32) -> (i32, i32) {
    %c0_i32 = arith.constant 0 : i32
    %c0_i32_0 = arith.constant 0 : i32
    %c0_i32_1 = arith.constant 0 : i32
    return %c0_i32, %c0_i32_0 : i32, i32
  }
  func.func @transform_6(%arg0: i32) -> (i32, i32) {
    %c0_i32 = arith.constant 0 : i32
    %c0_i32_0 = arith.constant 0 : i32
    %c0_i32_1 = arith.constant 0 : i32
    return %c0_i32, %c0_i32_0 : i32, i32
  }
  func.func @transform_7(%arg0: i32) -> (i32, i32) {
    %c0_i32 = arith.constant 0 : i32
    %c0_i32_0 = arith.constant 0 : i32
    return %arg0, %c0_i32 : i32, i32
  }
  func.func @transform_8(%arg0: i32) -> (i32, i32) {
    %c0_i32 = arith.constant 0 : i32
    %c0_i32_0 = arith.constant 0 : i32
    return %arg0, %c0_i32 : i32, i32
  }
}

</mosaic_0001>

<bundles_post_ra>
// kernel: csac_agent_forward.1
= control target key start
LH: loop header
LB: loop body
LE: loop exit
PB: predicated region body
PF: predicated region fallthrough
CT: control target
= control target key end

     0   :  { %v1267_v0 = vmov 0.0   ;;  %vm1268_vm0 = vmmov 0   ;;  %s1658_s2 = inlined_call_operand.vmem [shape: bf16[128,128], index: 2, kind: input, shape index: {}]   ;;  %s1659_s3 = inlined_call_operand.vmem [shape: bf16[256,512], index: 3, kind: input, shape index: {}]   ;;  %s1660_s0 = inlined_call_operand.vmem [shape: bf16[16,128], index: 0, kind: input, shape index: {}]   ;;  %s1661_s1 = inlined_call_operand.vmem [shape: f32[16,128], index: 1, kind: input, shape index: {}, may-alias: {1,8}]   ;;  %s1662_s6 = inlined_call_operand.vmem [shape: f32[1,896], index: 6, kind: input, shape index: {}]   ;;  %s1663_s4 = inlined_call_operand.vmem [shape: bf16[128,128], index: 4, kind: input, shape index: {}]   ;;  %s1664_s5 = inlined_call_operand.vmem [shape: bf16[128,128], index: 5, kind: input, shape index: {}]   ;;  %s1665_s8 = inlined_call_operand.vmem [shape: f32[16,128], index: 8, kind: output, shape index: {1}, may-alias: {1,8}]   ;;  %s1666_s7 = inlined_call_operand.vmem [shape: f32[16,128], index: 7, kind: output, shape index: {0}]  }
   0x1   :  { %1064 = vmatprep.subr.bf16.mxu0 %v1267_v0  ;;  %v1126_v1 = vld [vmem:[%s1658_s2] sm:$0xff]   ;;  %1080 = vmatprep.mubr.msk.bf16.mxu0 %vm1268_vm0, %v1267_v0  ;;  %v1127_v2 = vld [vmem:[%s1658_s2 + $0x8] sm:$0xff]   ;;  %v1128_v3 = vld [vmem:[%s1658_s2 + $0x10] sm:$0xff]  }
   0x2   :  { %1065 = vmatpush3.bf16.msra.mxu0 %v1126_v1  ;;  %v1135_v4 = vld [vmem:[%s1659_s3 + $0x4] ss:$16 sps:$4 sm:$0xff]   ;;  %v1129_v5 = vld [vmem:[%s1658_s2 + $0x18] sm:$0xff]   ;;  %v1140_v6 = vld [vmem:[%s1659_s3] ss:$16 sps:$4 sm:$0xff]  }
   0x3   :  { %1066 = vmatprep.subr.bf16.mxu0 %v1267_v0  ;;  %545 = vmatprep.subr.bf16.mxu1 %v1135_v4  ;;  %v1141_v7 = vld [vmem:[%s1659_s3 + $0x24] ss:$16 sps:$4 sm:$0xff]   ;;  %v1146_v9 = vld [vmem:[%s1659_s3 + $0x20] ss:$16 sps:$4 sm:$0xff]   ;;  %v1131_v11 = vld [vmem:[%s1658_s2 + $0x28] sm:$0xff]  }
   0x4   :  { %v1130_v8 = vld [vmem:[%s1658_s2 + $0x20] sm:$0xff]   ;;  %546 = vmatpush1.bf16.msra.mxu1 %v1140_v6  ;;  %v1132_v14 = vld [vmem:[%s1658_s2 + $0x30] sm:$0xff]   ;;  %v1133_v17 = vld [vmem:[%s1658_s2 + $0x38] sm:$0xff]  }
   0x5   :  { %547 = vmatprep.subr.bf16.mxu1 %v1141_v7  ;;  %v1147_v10 = vld [vmem:[%s1659_s3 + $0x44] ss:$16 sps:$4 sm:$0xff]   ;;  %v1152_v12 = vld [vmem:[%s1659_s3 + $0x40] ss:$16 sps:$4 sm:$0xff]   ;;  %v1139_v20 = vld [vmem:[%s1659_s3 + $0xc] ss:$16 sps:$4 sm:$0xff]  }
   0x6   :  { %1067 = vmatpush3.bf16.msra.mxu0 %v1127_v2  ;;  %v1153_v13 = vld [vmem:[%s1659_s3 + $0x64] ss:$16 sps:$4 sm:$0xff]   ;;  %v1158_v15 = vld [vmem:[%s1659_s3 + $0x60] ss:$16 sps:$4 sm:$0xff]   ;;  %v1137_v22 = vld [vmem:[%s1659_s3 + $0x8] ss:$16 sps:$4 sm:$0xff]  }
   0x7   :  { %1068 = vmatprep.subr.bf16.mxu0 %v1267_v0  ;;  %v1159_v16 = vld [vmem:[%s1659_s3 + $0x84] ss:$16 sps:$4 sm:$0xff]   ;;  %v1164_v18 = vld [vmem:[%s1659_s3 + $0x80] ss:$16 sps:$4 sm:$0xff]   ;;  %v1145_v25 = vld [vmem:[%s1659_s3 + $0x2c] ss:$16 sps:$4 sm:$0xff]  }
   0x8   :  { %548 = vmatpush1.bf16.msra.mxu1 %v1146_v9  ;;  %v1165_v19 = vld [vmem:[%s1659_s3 + $0xa4] ss:$16 sps:$4 sm:$0xff]   ;;  %v1170_v23 = vld [vmem:[%s1659_s3 + $0xa0] ss:$16 sps:$4 sm:$0xff]   ;;  %v1143_v26 = vld [vmem:[%s1659_s3 + $0x28] ss:$16 sps:$4 sm:$0xff]  }
   0x9   :  { %549 = vmatprep.subr.bf16.mxu1 %v1147_v10  ;;  %v1134_v21 = vld [vmem:[%s1660_s0] sm:$0xff]   ;;  %v1151_v29 = vld [vmem:[%s1659_s3 + $0x4c] ss:$16 sps:$4 sm:$0xff]   ;;  %v1149_v30 = vld [vmem:[%s1659_s3 + $0x48] ss:$16 sps:$4 sm:$0xff]  }
   0xa   :  { %1069 = vmatpush3.bf16.msra.mxu0 %v1128_v3  ;;  %v1171_v24 = vld [vmem:[%s1659_s3 + $0xc4] ss:$16 sps:$4 sm:$0xff]   ;;  %v1176_v27 = vld [vmem:[%s1659_s3 + $0xc0] ss:$16 sps:$4 sm:$0xff]   ;;  %v1157_v33 = vld [vmem:[%s1659_s3 + $0x6c] ss:$16 sps:$4 sm:$0xff]  }
   0xb   :  { %1070 = vmatprep.subr.bf16.mxu0 %v1267_v0  ;;  %v1177_v28 = vld [vmem:[%s1659_s3 + $0xe4] ss:$16 sps:$4 sm:$0xff]   ;;  %v1182_v31 = vld [vmem:[%s1659_s3 + $0xe0] ss:$16 sps:$4 sm:$0xff]   ;;  %v1155_v34 = vld [vmem:[%s1659_s3 + $0x68] ss:$16 sps:$4 sm:$0xff]  }
   0xc   :  { %550 = vmatpush1.bf16.msra.mxu1 %v1152_v12  ;;  %v1183_v32 = vld [vmem:[%s1659_s3 + $0x104] ss:$16 sps:$4 sm:$0xff]   ;;  %v1188_v35 = vld [vmem:[%s1659_s3 + $0x100] ss:$16 sps:$4 sm:$0xff]   ;;  %v1163_v37 = vld [vmem:[%s1659_s3 + $0x8c] ss:$16 sps:$4 sm:$0xff]  }
   0xd   :  { %551 = vmatprep.subr.bf16.mxu1 %v1153_v13  ;;  %v1189_v36 = vld [vmem:[%s1659_s3 + $0x124] ss:$16 sps:$4 sm:$0xff]   ;;  %v1161_v38 = vld [vmem:[%s1659_s3 + $0x88] ss:$16 sps:$4 sm:$0xff]   ;;  %v1194_v39 = vld [vmem:[%s1659_s3 + $0x120] ss:$16 sps:$4 sm:$0xff]  }
   0xe   :  { %1071 = vmatpush3.bf16.msra.mxu0 %v1129_v5  ;;  %v1169_v40 = vld [vmem:[%s1659_s3 + $0xac] ss:$16 sps:$4 sm:$0xff]   ;;  %v1195_v41 = vld [vmem:[%s1659_s3 + $0x144] ss:$16 sps:$4 sm:$0xff]   ;;  %v1200_v42 = vld [vmem:[%s1659_s3 + $0x140] ss:$16 sps:$4 sm:$0xff]  }
   0xf   :  { %1072 = vmatprep.subr.bf16.mxu0 %v1267_v0  ;;  %v1167_v43 = vld [vmem:[%s1659_s3 + $0xa8] ss:$16 sps:$4 sm:$0xff]   ;;  %v1201_v44 = vld [vmem:[%s1659_s3 + $0x164] ss:$16 sps:$4 sm:$0xff]   ;;  %v1175_v45 = vld [vmem:[%s1659_s3 + $0xcc] ss:$16 sps:$4 sm:$0xff]  }
  0x10   :  { %552 = vmatpush1.bf16.msra.mxu1 %v1158_v15  ;;  %v1206_v46 = vld [vmem:[%s1659_s3 + $0x160] ss:$16 sps:$4 sm:$0xff]   ;;  %v1173_v47 = vld [vmem:[%s1659_s3 + $0xc8] ss:$16 sps:$4 sm:$0xff]   ;;  %v1207_v48 = vld [vmem:[%s1659_s3 + $0x184] ss:$16 sps:$4 sm:$0xff]  }
  0x11   :  { %553 = vmatprep.subr.bf16.mxu1 %v1159_v16  ;;  %v1181_v49 = vld [vmem:[%s1659_s3 + $0xec] ss:$16 sps:$4 sm:$0xff]   ;;  %v1212_v50 = vld [vmem:[%s1659_s3 + $0x180] ss:$16 sps:$4 sm:$0xff]   ;;  %v1179_v51 = vld [vmem:[%s1659_s3 + $0xe8] ss:$16 sps:$4 sm:$0xff]  }
  0x12   :  { %1073 = vmatpush3.bf16.msra.mxu0 %v1130_v8  ;;  %v1213_v52 = vld [vmem:[%s1659_s3 + $0x1a4] ss:$16 sps:$4 sm:$0xff]   ;;  %v1187_v53 = vld [vmem:[%s1659_s3 + $0x10c] ss:$16 sps:$4 sm:$0xff]   ;;  %v1218_v54 = vld [vmem:[%s1659_s3 + $0x1a0] ss:$16 sps:$4 sm:$0xff]  }
  0x13   :  { %1074 = vmatprep.subr.bf16.mxu0 %v1267_v0  ;;  %v1185_v55 = vld [vmem:[%s1659_s3 + $0x108] ss:$16 sps:$4 sm:$0xff]   ;;  %v1193_v56 = vld [vmem:[%s1659_s3 + $0x12c] ss:$16 sps:$4 sm:$0xff]   ;;  %v1219_v3 = vld [vmem:[%s1659_s3 + $0x1c4] ss:$16 sps:$4 sm:$0xff]  }
  0x14   :  { %554 = vmatpush1.bf16.msra.mxu1 %v1164_v18  ;;  %v1191_v57 = vld [vmem:[%s1659_s3 + $0x128] ss:$16 sps:$4 sm:$0xff]   ;;  %v1199_v58 = vld [vmem:[%s1659_s3 + $0x14c] ss:$16 sps:$4 sm:$0xff]   ;;  %v1224_v6 = vld [vmem:[%s1659_s3 + $0x1c0] ss:$16 sps:$4 sm:$0xff]  }
  0x15   :  { %555 = vmatprep.subr.bf16.mxu1 %v1165_v19  ;;  %v1197_v59 = vld [vmem:[%s1659_s3 + $0x148] ss:$16 sps:$4 sm:$0xff]   ;;  %v1205_v60 = vld [vmem:[%s1659_s3 + $0x16c] ss:$16 sps:$4 sm:$0xff]   ;;  %v1225_v7 = vld [vmem:[%s1659_s3 + $0x1e4] ss:$16 sps:$4 sm:$0xff]  }
  0x16   :  { %1075 = vmatpush3.bf16.msra.mxu0 %v1131_v11  ;;  %v1203_v61 = vld [vmem:[%s1659_s3 + $0x168] ss:$16 sps:$4 sm:$0xff]   ;;  %v1211_v62 = vld [vmem:[%s1659_s3 + $0x18c] ss:$16 sps:$4 sm:$0xff]   ;;  %v1230_v10 = vld [vmem:[%s1659_s3 + $0x1e0] ss:$16 sps:$4 sm:$0xff]  }
  0x17   :  { %1076 = vmatprep.subr.bf16.mxu0 %v1267_v0  ;;  %v1209_v63 = vld [vmem:[%s1659_s3 + $0x188] ss:$16 sps:$4 sm:$0xff]   ;;  %v1217_v1 = vld [vmem:[%s1659_s3 + $0x1ac] ss:$16 sps:$4 sm:$0xff]   ;;  %v1546_v11 = vld [vmem:[%s1661_s1] sm:$0xff] }
  0x18   :  { %556 = vmatpush1.bf16.msra.mxu1 %v1170_v23  ;;  %v1215_v2 = vld [vmem:[%s1659_s3 + $0x1a8] ss:$16 sps:$4 sm:$0xff]   ;;  %v1223_v4 = vld [vmem:[%s1659_s3 + $0x1cc] ss:$16 sps:$4 sm:$0xff]  }
  0x19   :  { %557 = vmatprep.subr.bf16.mxu1 %v1171_v24  ;;  %v1221_v5 = vld [vmem:[%s1659_s3 + $0x1c8] ss:$16 sps:$4 sm:$0xff]   ;;  %v1229_v8 = vld [vmem:[%s1659_s3 + $0x1ec] ss:$16 sps:$4 sm:$0xff]   ;;  %v1231_v24 = vld [vmem:[%s1663_s4] sm:$0xff]  }
  0x1a   :  { %1077 = vmatpush3.bf16.msra.mxu0 %v1132_v14  ;;  %v1227_v9 = vld [vmem:[%s1659_s3 + $0x1e8] ss:$16 sps:$4 sm:$0xff]   ;;  %v937_v14 = vld [vmem:[%s1662_s6] ss:$0 sm:$0xff] }
  0x1b   :  { %1078 = vmatprep.subr.bf16.mxu0 %v1267_v0  ;;  %v1551_v12 = vld [vmem:[%s1661_s1 + $0x8] sm:$0xff] }
  0x1c   :  { %558 = vmatpush1.bf16.msra.mxu1 %v1176_v27  ;;  %v33_v13 = vpack.c.bf16 %v1551_v12, %v1546_v11  ;;  %v1234_v27 = vld [vmem:[%s1663_s4 + $0x18] sm:$0xff]  }
  0x1d   :  { %559 = vmatprep.subr.bf16.mxu1 %v1177_v28  ;;  %v1235_v28 = vld [vmem:[%s1663_s4 + $0x20] sm:$0xff]  }
  0x1e   :  { %1079 = vmatpush3.bf16.msra.mxu0 %v1133_v17  ;;  %577 = vmatprep.mubr.bf16.mxu1 %v33_v13 }
  0x1f   :  { %588 = vmatprep.subr.bf16.mxu0 %v1139_v20 }
  0x20   :  { %560 = vmatpush1.bf16.msra.mxu1 %v1182_v31  ;;  %v1238_v31 = vld [vmem:[%s1663_s4 + $0x38] sm:$0xff]  }
  0x21   :  { %1081 = vmatmul.mubr.bf16.vlgmr.msra.gmra.mrb[0].mxu0 %v1134_v21  ;;  %561 = vmatprep.subr.bf16.mxu1 %v1183_v32  ;;  %v1239_v32 = vld [vmem:[%s1664_s5] sm:$0xff]  }
  0x22   :  { %589 = vmatpush1.bf16.msra.mxu0 %v1137_v22  ;;  %620 = vmatprep.mubr.bf16.mxu0 %v33_v13 }
  0x23   :  { %590 = vmatprep.subr.bf16.mxu0 %v1145_v25  ;;  %v1232_v25 = vld [vmem:[%s1663_s4 + $0x8] sm:$0xff]  }
  0x24   :  { %562 = vmatpush1.bf16.msra.mxu1 %v1188_v35  ;;  %v1242_v35 = vld [vmem:[%s1664_s5 + $0x18] sm:$0xff]  }
  0x25   :  { %563 = vmatprep.subr.bf16.mxu1 %v1189_v36  ;;  %v1243_v36 = vld [vmem:[%s1664_s5 + $0x20] sm:$0xff]  }
  0x26   :  { %591 = vmatpush1.bf16.msra.mxu0 %v1143_v26  ;;  %v1233_v26 = vld [vmem:[%s1663_s4 + $0x10] sm:$0xff]  }
  0x27   :  { %592 = vmatprep.subr.bf16.mxu0 %v1151_v29  ;;  %v1236_v29 = vld [vmem:[%s1663_s4 + $0x28] sm:$0xff]  }
  0x28   :  { %564 = vmatpush1.bf16.msra.mxu1 %v1194_v39 }
  0x29   :  { %565 = vmatprep.subr.bf16.mxu1 %v1195_v41 }
  0x2a   :  { %593 = vmatpush1.bf16.msra.mxu0 %v1149_v30  ;;  %v1237_v30 = vld [vmem:[%s1663_s4 + $0x30] sm:$0xff]  }
  0x2b   :  { %594 = vmatprep.subr.bf16.mxu0 %v1157_v33  ;;  %v1240_v33 = vld [vmem:[%s1664_s5 + $0x8] sm:$0xff]  }
  0x2c   :  { %566 = vmatpush1.bf16.msra.mxu1 %v1200_v42 }
  0x2d   :  { %567 = vmatprep.subr.bf16.mxu1 %v1201_v44 }
  0x2e   :  { %595 = vmatpush1.bf16.msra.mxu0 %v1155_v34  ;;  %v1241_v34 = vld [vmem:[%s1664_s5 + $0x10] sm:$0xff]  }
  0x2f   :  { %596 = vmatprep.subr.bf16.mxu0 %v1163_v37  ;;  %v1244_v37 = vld [vmem:[%s1664_s5 + $0x28] sm:$0xff]  }
  0x30   :  { %568 = vmatpush1.bf16.msra.mxu1 %v1206_v46 }
  0x31   :  { %569 = vmatprep.subr.bf16.mxu1 %v1207_v48 }
  0x32   :  { %597 = vmatpush1.bf16.msra.mxu0 %v1161_v38  ;;  %v1011_v38 = vld [vmem:[%s1662_s6 + $0x1] ss:$0 sm:$0xff] }
  0x33   :  { %598 = vmatprep.subr.bf16.mxu0 %v1169_v40 }
  0x34   :  { %570 = vmatpush1.bf16.msra.mxu1 %v1212_v50 }
  0x35   :  { %571 = vmatprep.subr.bf16.mxu1 %v1213_v52 }
  0x36   :  { %599 = vmatpush1.bf16.msra.mxu0 %v1167_v43 }
  0x37   :  { %600 = vmatprep.subr.bf16.mxu0 %v1175_v45 }
  0x38   :  { %572 = vmatpush1.bf16.msra.mxu1 %v1218_v54 }
  0x39   :  { %573 = vmatprep.subr.bf16.mxu1 %v1219_v3 }
  0x3a   :  { %601 = vmatpush1.bf16.msra.mxu0 %v1173_v47 }
  0x3b   :  { %602 = vmatprep.subr.bf16.mxu0 %v1181_v49 }
  0x3c   :  { %574 = vmatpush1.bf16.msra.mxu1 %v1224_v6 }
  0x3d   :  { %575 = vmatprep.subr.bf16.mxu1 %v1225_v7 }
  0x3e   :  { %603 = vmatpush1.bf16.msra.mxu0 %v1179_v51  ;;  %v1014_v51 = vld [vmem:[%s1662_s6 + $0x2] ss:$0 sm:$0xff] }
  0x3f   :  { %604 = vmatprep.subr.bf16.mxu0 %v1187_v53 }
  0x40   :  { %576 = vmatpush1.bf16.msra.mxu1 %v1230_v10 }
  0x41   :  { %1084 = vmatprep.subr.bf16.mxu1 %v1267_v0 }
  0x42   :  { %605 = vmatpush1.bf16.msra.mxu0 %v1185_v55 }
  0x43   :  { %606 = vmatprep.subr.bf16.mxu0 %v1193_v56 }
  0x46   :  { %607 = vmatpush1.bf16.msra.mxu0 %v1191_v57 }
  0x47   :  { %608 = vmatprep.subr.bf16.mxu0 %v1199_v58 }
  0x4a   :  { %609 = vmatpush1.bf16.msra.mxu0 %v1197_v59 }
  0x4b   :  { %610 = vmatprep.subr.bf16.mxu0 %v1205_v60  ;;  %v1018_v60 = vld [vmem:[%s1662_s6 + $0x4] ss:$0 sm:$0xff] }
  0x4e   :  { %611 = vmatpush1.bf16.msra.mxu0 %v1203_v61  ;;  %v1017_v61 = vld [vmem:[%s1662_s6 + $0x3] ss:$0 sm:$0xff] }
  0x4f   :  { %612 = vmatprep.subr.bf16.mxu0 %v1211_v62 }
  0x52   :  { %613 = vmatpush1.bf16.msra.mxu0 %v1209_v63 }
  0x53   :  { %614 = vmatprep.subr.bf16.mxu0 %v1217_v1 }
  0x56   :  { %615 = vmatpush1.bf16.msra.mxu0 %v1215_v2 }
  0x57   :  { %616 = vmatprep.subr.bf16.mxu0 %v1223_v4 }
  0x5a   :  { %617 = vmatpush1.bf16.msra.mxu0 %v1221_v5 }
  0x5b   :  { %618 = vmatprep.subr.bf16.mxu0 %v1229_v8 }
  0x5e   :  { %619 = vmatpush1.bf16.msra.mxu0 %v1227_v9 }
  0x5f   :  { %1104 = vmatprep.subr.bf16.mxu0 %v1267_v0 }
  0xf4   :  { %v151_v15 = vpop.f32.mrb[0].mxu0 }
  0xf5   :  { %v152_v16 = vadd.f32 %v937_v14, %v151_v15  ;;  %v1082_v17 = vpop.f32.mrb[1].mxu0 }
  0xf6   :  { %v154_v18 = vpop.f32.mrb[2].mxu0 }
  0xf7   :  { %v155_v19 = vadd.f32 %v937_v14, %v154_v18  ;;  %v1083_v20 = vpop.f32.mrb[3].mxu0  ;;  %v158_v21 = vmax.f32 %v152_v16, 0.0 }
  0xf9   :  { %v159_v22 = vmax.f32 %v155_v19, 0.0 }
  0xfb   :  { %v160_v23 = vpack.c.bf16 %v159_v22, %v158_v21 }
  0xfd   :  { %578 = vmatmul.mubr.bf16.vlgmr.msra.gmra.mrb[0].mxu1 %v160_v23  ;;  %621 = vmatmul.mubr.bf16.vlgmr.msra.gmra.mrb[4].mxu0 %v160_v23 }
  0xfe   :  { %1100 = vmatprep.mubr.msk.bf16.mxu1 %vm1268_vm0, %v1267_v0  ;;  %1120 = vmatprep.mubr.msk.bf16.mxu0 %vm1268_vm0, %v1267_v0 }
  0xff   :  { %1085 = vmatpush3.bf16.msra.mxu1 %v1231_v24  ;;  %1105 = vmatpush3.bf16.msra.mxu0 %v1239_v32 }
 0x100   :  { %1086 = vmatprep.subr.bf16.mxu1 %v1267_v0  ;;  %1106 = vmatprep.subr.bf16.mxu0 %v1267_v0 }
 0x103   :  { %1087 = vmatpush3.bf16.msra.mxu1 %v1232_v25  ;;  %1107 = vmatpush3.bf16.msra.mxu0 %v1240_v33 }
 0x104   :  { %1088 = vmatprep.subr.bf16.mxu1 %v1267_v0  ;;  %1108 = vmatprep.subr.bf16.mxu0 %v1267_v0 }
 0x107   :  { %1089 = vmatpush3.bf16.msra.mxu1 %v1233_v26  ;;  %1109 = vmatpush3.bf16.msra.mxu0 %v1241_v34  ;;  %v1019_v26 = vld [vmem:[%s1662_s6 + $0x5] ss:$0 sm:$0xff] }
 0x108   :  { %1090 = vmatprep.subr.bf16.mxu1 %v1267_v0  ;;  %1110 = vmatprep.subr.bf16.mxu0 %v1267_v0 }
 0x10b   :  { %1091 = vmatpush3.bf16.msra.mxu1 %v1234_v27  ;;  %1111 = vmatpush3.bf16.msra.mxu0 %v1242_v35 }
 0x10c   :  { %1092 = vmatprep.subr.bf16.mxu1 %v1267_v0  ;;  %1112 = vmatprep.subr.bf16.mxu0 %v1267_v0 }
 0x10f   :  { %1093 = vmatpush3.bf16.msra.mxu1 %v1235_v28  ;;  %1113 = vmatpush3.bf16.msra.mxu0 %v1243_v36 }
 0x110   :  { %1094 = vmatprep.subr.bf16.mxu1 %v1267_v0  ;;  %1114 = vmatprep.subr.bf16.mxu0 %v1267_v0 }
 0x113   :  { %1095 = vmatpush3.bf16.msra.mxu1 %v1236_v29  ;;  %1115 = vmatpush3.bf16.msra.mxu0 %v1244_v37 }
 0x114   :  { %1096 = vmatprep.subr.bf16.mxu1 %v1267_v0  ;;  %1116 = vmatprep.subr.bf16.mxu0 %v1267_v0 }
 0x117   :  { %1097 = vmatpush3.bf16.msra.mxu1 %v1237_v30 }
 0x118   :  { %1098 = vmatprep.subr.bf16.mxu1 %v1267_v0 }
 0x11b   :  { %1099 = vmatpush3.bf16.msra.mxu1 %v1238_v31 }
 0x1d0   :  { %v579_v39 = vpop.f32.mrb[0].mxu1  ;;  %v622_v40 = vpop.f32.mrb[4].mxu0 }
 0x1d1   :  { %v637_v41 = vadd.f32 %v1011_v38, %v579_v39  ;;  %v581_v42 = vpop.f32.mrb[1].mxu1  ;;  %v624_v43 = vpop.f32.mrb[5].mxu0  ;;  %v677_v3 = vadd.f32 %v1017_v61, %v622_v40 }
 0x1d2   :  { %v583_v44 = vpop.f32.mrb[2].mxu1  ;;  %v626_v45 = vpop.f32.mrb[6].mxu0  ;;  %v657_v52 = vadd.f32 %v1014_v51, %v581_v42  ;;  %v685_v63 = vadd.f32 %v1018_v60, %v624_v43 }
 0x1d3   :  { %v1012_v46 = vmul.f32 -1.442695, %v637_v41  ;;  %v638_v47 = vadd.f32 %v1011_v38, %v583_v44  ;;  %v585_v48 = vpop.f32.mrb[3].mxu1  ;;  %v628_v49 = vpop.f32.mrb[7].mxu0  ;;  %v678_v9 = vadd.f32 %v1017_v61, %v626_v45 }
 0x1d4   :  { %v658_v53 = vadd.f32 %v1014_v51, %v585_v48  ;;  %v1015_v54 = vmul.f32 -1.442695, %v657_v52  ;;  %v686_v5 = vadd.f32 %v1018_v60, %v628_v49 }
 0x1d5   :  { %1247 = vpow2.f32 %v1012_v46  ;;  %v1013_v50 = vmul.f32 -1.442695, %v638_v47 }
 0x1d6   :  { %v1016_v56 = vmul.f32 -1.442695, %v658_v53 }
 0x1d7   :  { %1249 = vpow2.f32 %v1013_v50 }
 0x1d8   :  { %1251 = vpow2.f32 %v1015_v54 }
 0x1df   :  { %v1248_v55 = vpop.eup %1247 }
 0x1e0   :  { %v645_v57 = vadd.f32 1.0, %v1248_v55 }
 0x1e1   :  { %v1250_v58 = vpop.eup %1249 }
 0x1e2   :  { %1253 = vrcp.f32 %v645_v57  ;;  %v646_v59 = vadd.f32 1.0, %v1250_v58  ;;  %v1252_v62 = vpop.eup %1251 }
 0x1e3   :  { %1255 = vpow2.f32 %v1016_v56  ;;  %v665_v7 = vadd.f32 1.0, %v1252_v62 }
 0x1e4   :  { %1257 = vrcp.f32 %v646_v59 }
 0x1ec   :  { %v1254_v1 = vpop.eup %1253 }
 0x1ed   :  { %v1256_v2 = vpop.eup %1255  ;;  %v687_v4 = vmul.f32 %v1254_v1, %v685_v63 }
 0x1ee   :  { %v1258_v6 = vpop.eup %1257  ;;  %v666_v13 = vadd.f32 1.0, %v1256_v2 }
 0x1ef   :  { %v689_v8 = vadd.f32 %v687_v4, %v677_v3  ;;  %v688_v10 = vmul.f32 %v1258_v6, %v686_v5 }
 0x1f1   :  { %1259 = vtanh.f32 %v689_v8  ;;  %v690_v14 = vadd.f32 %v688_v10, %v678_v9 }
 0x1f2   :  { %1261 = vrcp.f32 %v665_v7 }
 0x1f3   :  { %1263 = vtanh.f32 %v690_v14 }
 0x1f4   :  { %1265 = vrcp.f32 %v666_v13 }
 0x1fb   :  { %v1260_v15 = vpop.eup %1259 }
 0x1fc   :  { %v1262_v16 = vpop.eup %1261  ;;  %v693_v17 = vsub.f32 %v1546_v11, %v1260_v15  ;;  %v1245_v11 = vld [vmem:[%s1664_s5 + $0x30] sm:$0xff]  }
 0x1fd   :  { %v1264_v18 = vpop.eup %1263  ;;  %1117 = vmatpush3.bf16.msra.mxu0 %v1245_v11 }
 0x1fe   :  { %v694_v19 = vsub.f32 %v1551_v12, %v1264_v18  ;;  %v695_v20 = vmul.f32 %v1262_v16, %v693_v17  ;;  %v1266_v21 = vpop.eup %1265  ;;  %1118 = vmatprep.subr.bf16.mxu0 %v1267_v0  ;;  %v1246_v12 = vld [vmem:[%s1664_s5 + $0x38] sm:$0xff]   ;;  %v1028_v0 = vld [vmem:[%s1662_s6 + $0x6] ss:$0 sm:$0xff] }
 0x200   :  { %v696_v22 = vmul.f32 %v1266_v21, %v694_v19  ;;  %v697_v23 = vadd.f32 %v1260_v15, %v695_v20 }
 0x201   :  { %1119 = vmatpush3.bf16.msra.mxu0 %v1246_v12 }
 0x202   :  { %v698_v24 = vadd.f32 %v1264_v18, %v696_v22  ;;  %927 = vst [vmem:[%s1665_s8] sm:$0xff] %v697_v23 }
 0x204   :  { %v699_v25 = vpack.c.bf16 %v698_v24, %v697_v23  ;;  %928 = vst [vmem:[%s1665_s8 + $0x8] sm:$0xff] %v698_v24 }
 0x206   :  { %1101 = vmatmul.mubr.bf16.vlgmr.msra.gmra.mrb[4].mxu1 %v699_v25 }
 0x2d9   :  { %v804_v27 = vpop.f32.mrb[4].mxu1 }
 0x2da   :  { %v805_v28 = vadd.f32 %v1019_v26, %v804_v27  ;;  %v1102_v29 = vpop.f32.mrb[5].mxu1 }
 0x2db   :  { %v807_v30 = vpop.f32.mrb[6].mxu1 }
 0x2dc   :  { %v808_v31 = vadd.f32 %v1019_v26, %v807_v30  ;;  %v1103_v32 = vpop.f32.mrb[7].mxu1  ;;  %v811_v33 = vmax.f32 %v805_v28, 0.0 }
 0x2de   :  { %v812_v34 = vmax.f32 %v808_v31, 0.0 }
 0x2e0   :  { %v813_v35 = vpack.c.bf16 %v812_v34, %v811_v33 }
 0x2e2   :  { %1121 = vmatmul.mubr.bf16.vlgmr.msra.gmra.mrb[8].mxu0 %v813_v35 }
 0x3b5   :  { %v918_v36 = vpop.f32.mrb[8].mxu0 }
 0x3b6   :  { %v919_v37 = vadd.f32 %v1028_v0, %v918_v36  ;;  %v1122_v38 = vpop.f32.mrb[9].mxu0 }
 0x3b7   :  { %v921_v39 = vpop.f32.mrb[10].mxu0 }
 0x3b8   :  { %925 = vst [vmem:[%s1666_s7] sm:$0xff] %v919_v37  ;;  %v922_v40 = vadd.f32 %v1028_v0, %v921_v39  ;;  %v1123_v41 = vpop.f32.mrb[11].mxu0 }
 0x3ba   :  { %926 = vst [vmem:[%s1666_s7 + $0x8] sm:$0xff] %v922_v40 }

</bundles_post_ra>
